<compile_context>
chip_gen: v5e
topology: v5e:2x2
jax: 0.10.0
libtpu: 0.0.40
codegen_flags: <defaults>
</compile_context>

<pallas_src>
import jax
import jax.numpy as jnp
from jax.experimental import pallas as pl
from jax.experimental.pallas import tpu as pltpu

IN_FEATURES = 2
HIDDEN = 100
NUM_CLASSES = 3
HIDDEN_P = 128     # hidden / logit lane width (padded 100 -> 128, 3 -> 128)
OUT_SUB = 8        # class rows kept in the transposed (class-major) output
NEG_INF = -1e30


def _round_up(n, m):
    return ((n + m - 1) // m) * m


def mlp_kernel(x_ref, w1_ref, b1_ref, w2_ref, b2_ref, w3_ref, b3_ref, o_ref):
    x = x_ref[...]                                        # (tb, 2)  f32

    # ---- fc1 + ReLU on the VPU (K=2 is far too small for the MXU) ----------
    w1 = w1_ref[...]                                      # (2, 128) f32
    h1 = (x[:, 0:1] * w1[0:1, :]
          + x[:, 1:2] * w1[1:2, :]
          + b1_ref[...])                                  # (tb, 128)
    h1 = jnp.maximum(h1, 0.0)

    # ---- fc2 on the MXU (bf16 operands, f32 accumulation) ------------------
    w2 = w2_ref[...]                                      # (128, 128) bf16
    h2 = jnp.dot(h1.astype(w2.dtype), w2,
                 preferred_element_type=jnp.float32) + b2_ref[...]

    # ---- fc3 on the MXU; padded w3 cols are zero, so padded logit lanes -----
    # ---- equal exactly b3_pad = -1e30 (class mask baked into the bias). -----
    w3 = w3_ref[...]                                      # (128, 128) bf16
    logits = jnp.dot(h2.astype(w3.dtype), w3,
                     preferred_element_type=jnp.float32) + b3_ref[...]

    # ---- transpose to class-major (XLU, otherwise idle) + stable softmax ----
    lt = jnp.transpose(logits)[:OUT_SUB, :]               # (8, tb) f32
    m = jnp.max(lt, axis=0, keepdims=True)                # (1, tb)
    e = jnp.exp(lt - m)                                   # pad rows: exp(-1e30)=0
    denom = jnp.sum(e, axis=0, keepdims=True)             # (1, tb)
    # Lane-dense (8, tb) store -> unmasked vst, 16x fewer output HBM bytes.
    o_ref[...] = (e * pl.reciprocal(denom, approx=True)).astype(o_ref.dtype)


def net_forward(x, padded_params, *, tile_b=4096):
    """Forward pass. x: (B, 2) f32. Returns (B, 3) softmax probabilities."""
    w1, b1, w2, b2, w3, b3 = padded_params

    B = x.shape[0]
    # Batch tile: multiple of 128 (lane-dense transposed output block), capped
    # by the padded batch; prefer >=2 grid steps so both v7x TensorCores work.
    tb = min(_round_up(tile_b, 128), _round_up(B, 128))
    if _round_up(B, tb) == tb and B > 128:
        tb = _round_up((B + 1) // 2, 128)
    bp = _round_up(B, tb)
    if bp != B:
        x = jnp.pad(x, ((0, bp - B), (0, 0)))

    # Weights/biases: constant index map -> fetched once, VMEM-resident.
    const = lambda a: pl.BlockSpec(a.shape, lambda i: (0,) * a.ndim)

    out = pl.pallas_call(
        mlp_kernel,
        out_shape=jax.ShapeDtypeStruct((OUT_SUB, bp), jnp.float32),
        grid=(bp // tb,),
        in_specs=[
            pl.BlockSpec((tb, IN_FEATURES), lambda i: (i, 0)),   # x: batch-tiled
            const(w1), const(b1), const(w2), const(b2), const(w3), const(b3),
        ],
        out_specs=pl.BlockSpec((OUT_SUB, tb), lambda i: (0, i)),  # lane-dense
        compiler_params=pltpu.CompilerParams(
            dimension_semantics=("parallel",),
            vmem_limit_bytes=32 * 1024 * 1024),
    )(x, w1, b1, w2, b2, w3, b3)

    # (8, bp) class-major slab -> (B, 3); the slice only touches 32 B/row.
    return out[:NUM_CLASSES, :B].T


def init_params(key):
    """nn.Linear-style init; weights stored transposed as (in, out)."""
    ks = jax.random.split(key, 6)

    def uni(k, shape, fan_in):
        bound = 1.0 / jnp.sqrt(fan_in)
        return jax.random.uniform(k, shape, jnp.float32, -bound, bound)

    w1 = uni(ks[0], (IN_FEATURES, HIDDEN), IN_FEATURES)    # fc1.weight.T
    b1 = uni(ks[1], (1, HIDDEN), IN_FEATURES)              # fc1.bias
    w2 = uni(ks[2], (HIDDEN, HIDDEN), HIDDEN)              # fc2.weight.T
    b2 = uni(ks[3], (1, HIDDEN), HIDDEN)                   # fc2.bias
    w3 = uni(ks[4], (HIDDEN, NUM_CLASSES), HIDDEN)         # fc3.weight.T
    b3 = uni(ks[5], (1, NUM_CLASSES), HIDDEN)              # fc3.bias
    return (w1, b1, w2, b2, w3, b3)


def pad_params(params, *, bf16_weights=True):
    """Zero-pad to MXU/lane-friendly shapes (exact: ReLU(0)=0 and zero weight
    rows/cols contribute nothing), bake the padded-class softmax mask into b3,
    and pre-cast the big matmul weights to bf16 once (no per-call convert)."""
    w1, b1, w2, b2, w3, b3 = params
    pad = lambda a, r, c: jnp.pad(a, ((0, r - a.shape[0]), (0, c - a.shape[1])))
    w1p, b1p = pad(w1, IN_FEATURES, HIDDEN_P), pad(b1, 1, HIDDEN_P)
    w2p, b2p = pad(w2, HIDDEN_P, HIDDEN_P), pad(b2, 1, HIDDEN_P)
    w3p = pad(w3, HIDDEN_P, HIDDEN_P)
    # Padded w3 columns are zero, so padded logits == b3_pad; set them to -1e30
    # so exp() underflows to exactly 0 in the softmax (no in-kernel mask).
    class_mask = jnp.where(jnp.arange(HIDDEN_P) < NUM_CLASSES, 0.0, NEG_INF)
    b3p = pad(b3, 1, HIDDEN_P) + class_mask[None, :].astype(jnp.float32)
    if bf16_weights:
        w2p, w3p = w2p.astype(jnp.bfloat16), w3p.astype(jnp.bfloat16)
    return (w1p, b1p, w2p, b2p, w3p, b3p)


def reference_forward(x, params, *, bf16_weights=True):
    """Plain-JAX reference on the unpadded params."""
    w1, b1, w2, b2, w3, b3 = params
    h = jnp.maximum(x @ w1 + b1, 0.0)
    if bf16_weights:
        h = jnp.dot(h.astype(jnp.bfloat16), w2.astype(jnp.bfloat16),
                    preferred_element_type=jnp.float32) + b2
        logits = jnp.dot(h.astype(jnp.bfloat16), w3.astype(jnp.bfloat16),
                         preferred_element_type=jnp.float32) + b3
    else:
        h = h @ w2 + b2
        logits = h @ w3 + b3
    return jax.nn.softmax(logits, axis=1)


if __name__ == "__main__":
    key = jax.random.PRNGKey(0)
    k_x, k_p = jax.random.split(key)

    B = 200   # not a multiple of 128: exercises batch padding + a 2-step grid
    x = jax.random.normal(k_x, (B, IN_FEATURES), dtype=jnp.float32)
    params = init_params(k_p)
    padded = pad_params(params, bf16_weights=True)

    # tile_b=128 so this small demo runs a multi-step batch grid; real
    # workloads should keep the default tile_b=4096.
    out = net_forward(x, padded, tile_b=128)
    out = jax.block_until_ready(out)

    assert out.shape == (B, NUM_CLASSES)
    # rows sum to ~1 (softmax; tolerance covers the EUP approx reciprocal)
    assert jnp.allclose(jnp.sum(out, axis=1), 1.0, atol=5e-3)
    # matches the plain-JAX reference computed the same way (bf16 fc2/fc3)
    ref_bf16 = reference_forward(x, params, bf16_weights=True)
    assert jnp.allclose(out, ref_bf16, atol=5e-3), "mismatch vs bf16 reference"
    # and stays close to the full-f32 PyTorch-equivalent forward
    ref_f32 = reference_forward(x, params, bf16_weights=False)
    assert jnp.allclose(out, ref_f32, atol=2e-2), "mismatch vs f32 reference"

    print("KERNEL_OK")
</pallas_src>

<mosaic_0001>
module attributes {stable_mosaic.version = 11 : i64} {
  func.func @mlp_kernel(%arg0: i32, %arg1: memref<128x2xf32, #tpu.memory_space<vmem>>, %arg2: memref<2x128xf32, #tpu.memory_space<vmem>>, %arg3: memref<1x128xf32, #tpu.memory_space<vmem>>, %arg4: memref<128x128xbf16, #tpu.memory_space<vmem>>, %arg5: memref<1x128xf32, #tpu.memory_space<vmem>>, %arg6: memref<128x128xbf16, #tpu.memory_space<vmem>>, %arg7: memref<1x128xf32, #tpu.memory_space<vmem>>, %arg8: memref<8x128xf32, #tpu.memory_space<vmem>>) attributes {dimension_semantics = [#tpu.dimension_semantics<parallel>], iteration_bounds = array<i64: 2>, scalar_prefetch = 0 : i64, scratch_operands = 0 : i64, tpu.core_type = #tpu.core_type<tc>, window_params = [{transform_indices = @transform_0, window_bounds = array<i64: 128, 2>}, {pipeline_mode = #tpu.pipeline_mode<synchronous>, transform_indices = @transform_1, window_bounds = array<i64: 2, 128>}, {pipeline_mode = #tpu.pipeline_mode<synchronous>, transform_indices = @transform_2, window_bounds = array<i64: 1, 128>}, {pipeline_mode = #tpu.pipeline_mode<synchronous>, transform_indices = @transform_3, window_bounds = array<i64: 128, 128>}, {pipeline_mode = #tpu.pipeline_mode<synchronous>, transform_indices = @transform_4, window_bounds = array<i64: 1, 128>}, {pipeline_mode = #tpu.pipeline_mode<synchronous>, transform_indices = @transform_5, window_bounds = array<i64: 128, 128>}, {pipeline_mode = #tpu.pipeline_mode<synchronous>, transform_indices = @transform_6, window_bounds = array<i64: 1, 128>}, {transform_indices = @transform_7, window_bounds = array<i64: 8, 128>}]} {
    %c0 = arith.constant 0 : index
    %c0_0 = arith.constant 0 : index
    %0 = vector.load %arg1[%c0, %c0_0] : memref<128x2xf32, #tpu.memory_space<vmem>>, vector<128x2xf32>
    %c0_1 = arith.constant 0 : index
    %c0_2 = arith.constant 0 : index
    %1 = vector.load %arg2[%c0_1, %c0_2] : memref<2x128xf32, #tpu.memory_space<vmem>>, vector<2x128xf32>
    %2 = vector.extract_strided_slice %0 {offsets = [0, 0], sizes = [128, 1], strides = [1, 1]} : vector<128x2xf32> to vector<128x1xf32>
    %3 = vector.extract_strided_slice %1 {offsets = [0, 0], sizes = [1, 128], strides = [1, 1]} : vector<2x128xf32> to vector<1x128xf32>
    %4 = vector.broadcast %2 : vector<128x1xf32> to vector<128x128xf32>
    %5 = vector.broadcast %3 : vector<1x128xf32> to vector<128x128xf32>
    %6 = arith.mulf %4, %5 : vector<128x128xf32>
    %7 = vector.extract_strided_slice %0 {offsets = [0, 1], sizes = [128, 1], strides = [1, 1]} : vector<128x2xf32> to vector<128x1xf32>
    %8 = vector.extract_strided_slice %1 {offsets = [1, 0], sizes = [1, 128], strides = [1, 1]} : vector<2x128xf32> to vector<1x128xf32>
    %9 = vector.broadcast %7 : vector<128x1xf32> to vector<128x128xf32>
    %10 = vector.broadcast %8 : vector<1x128xf32> to vector<128x128xf32>
    %11 = arith.mulf %9, %10 : vector<128x128xf32>
    %12 = arith.addf %6, %11 : vector<128x128xf32>
    %c0_3 = arith.constant 0 : index
    %c0_4 = arith.constant 0 : index
    %13 = vector.load %arg3[%c0_3, %c0_4] : memref<1x128xf32, #tpu.memory_space<vmem>>, vector<1x128xf32>
    %14 = vector.broadcast %13 : vector<1x128xf32> to vector<128x128xf32>
    %15 = arith.addf %12, %14 : vector<128x128xf32>
    %cst = arith.constant 0.000000e+00 : f32
    %16 = vector.broadcast %cst : f32 to vector<128x128xf32>
    %17 = arith.maximumf %15, %16 : vector<128x128xf32>
    %c0_5 = arith.constant 0 : index
    %c0_6 = arith.constant 0 : index
    %18 = vector.load %arg4[%c0_5, %c0_6] : memref<128x128xbf16, #tpu.memory_space<vmem>>, vector<128x128xbf16>
    %19 = arith.truncf %17 : vector<128x128xf32> to vector<128x128xbf16>
    %cst_7 = arith.constant dense<0.000000e+00> : vector<128x128xf32>
    %20 = tpu.matmul %19, %18, %cst_7 {dimension_numbers = #tpu.dot_dimension_numbers<[1], [0], [0], [1], [0, 0, 1, 1], [], []>} : vector<128x128xbf16>, vector<128x128xbf16>, vector<128x128xf32> -> vector<128x128xf32>
    %c0_8 = arith.constant 0 : index
    %c0_9 = arith.constant 0 : index
    %21 = vector.load %arg5[%c0_8, %c0_9] : memref<1x128xf32, #tpu.memory_space<vmem>>, vector<1x128xf32>
    %22 = vector.broadcast %21 : vector<1x128xf32> to vector<128x128xf32>
    %23 = arith.addf %20, %22 : vector<128x128xf32>
    %c0_10 = arith.constant 0 : index
    %c0_11 = arith.constant 0 : index
    %24 = vector.load %arg6[%c0_10, %c0_11] : memref<128x128xbf16, #tpu.memory_space<vmem>>, vector<128x128xbf16>
    %25 = arith.truncf %23 : vector<128x128xf32> to vector<128x128xbf16>
    %cst_12 = arith.constant dense<0.000000e+00> : vector<128x128xf32>
    %26 = tpu.matmul %25, %24, %cst_12 {dimension_numbers = #tpu.dot_dimension_numbers<[1], [0], [0], [1], [0, 0, 1, 1], [], []>} : vector<128x128xbf16>, vector<128x128xbf16>, vector<128x128xf32> -> vector<128x128xf32>
    %c0_13 = arith.constant 0 : index
    %c0_14 = arith.constant 0 : index
    %27 = vector.load %arg7[%c0_13, %c0_14] : memref<1x128xf32, #tpu.memory_space<vmem>>, vector<1x128xf32>
    %28 = vector.broadcast %27 : vector<1x128xf32> to vector<128x128xf32>
    %29 = arith.addf %26, %28 : vector<128x128xf32>
    %30 = tpu.transpose %29, [1, 0] : vector<128x128xf32> -> vector<128x128xf32>
    %31 = vector.extract_strided_slice %30 {offsets = [0, 0], sizes = [8, 128], strides = [1, 1]} : vector<128x128xf32> to vector<8x128xf32>
    %cst_15 = arith.constant dense<0xFF800000> : vector<128xf32>
    %32 = vector.multi_reduction <maximumf>, %31, %cst_15 [0] : vector<8x128xf32> to vector<128xf32>
    %33 = vector.shape_cast %32 : vector<128xf32> to vector<1x128xf32>
    %34 = vector.broadcast %33 : vector<1x128xf32> to vector<8x128xf32>
    %35 = arith.subf %31, %34 : vector<8x128xf32>
    %36 = math.exp %35 : vector<8x128xf32>
    %cst_16 = arith.constant dense<0.000000e+00> : vector<128xf32>
    %37 = vector.multi_reduction <add>, %36, %cst_16 [0] : vector<8x128xf32> to vector<128xf32>
    %38 = vector.shape_cast %37 : vector<128xf32> to vector<1x128xf32>
    %39 = tpu.reciprocal %38 {approx = true} : vector<1x128xf32> -> vector<1x128xf32>
    %40 = vector.broadcast %39 : vector<1x128xf32> to vector<8x128xf32>
    %41 = arith.mulf %36, %40 : vector<8x128xf32>
    %c0_17 = arith.constant 0 : index
    %c0_18 = arith.constant 0 : index
    %42 = vector.load %arg8[%c0_17, %c0_18] : memref<8x128xf32, #tpu.memory_space<vmem>>, vector<8x128xf32>
    tpu.vector_store %arg8[%c0_17, %c0_18], %41 {strides = array<i32>} : memref<8x128xf32, #tpu.memory_space<vmem>>, vector<8x128xf32>,
    return
  }
  func.func @transform_0(%arg0: i32) -> (i32, i32) {
    %c0_i32 = arith.constant 0 : i32
    %c0_i32_0 = arith.constant 0 : i32
    return %arg0, %c0_i32 : i32, i32
  }
  func.func @transform_1(%arg0: i32) -> (i32, i32) {
    %c0_i32 = arith.constant 0 : i32
    %c0_i32_0 = arith.constant 0 : i32
    %c0_i32_1 = arith.constant 0 : i32
    return %c0_i32, %c0_i32_0 : i32, i32
  }
  func.func @transform_2(%arg0: i32) -> (i32, i32) {
    %c0_i32 = arith.constant 0 : i32
    %c0_i32_0 = arith.constant 0 : i32
    %c0_i32_1 = arith.constant 0 : i32
    return %c0_i32, %c0_i32_0 : i32, i32
  }
  func.func @transform_3(%arg0: i32) -> (i32, i32) {
    %c0_i32 = arith.constant 0 : i32
    %c0_i32_0 = arith.constant 0 : i32
    %c0_i32_1 = arith.constant 0 : i32
    return %c0_i32, %c0_i32_0 : i32, i32
  }
  func.func @transform_4(%arg0: i32) -> (i32, i32) {
    %c0_i32 = arith.constant 0 : i32
    %c0_i32_0 = arith.constant 0 : i32
    %c0_i32_1 = arith.constant 0 : i32
    return %c0_i32, %c0_i32_0 : i32, i32
  }
  func.func @transform_5(%arg0: i32) -> (i32, i32) {
    %c0_i32 = arith.constant 0 : i32
    %c0_i32_0 = arith.constant 0 : i32
    %c0_i32_1 = arith.constant 0 : i32
    return %c0_i32, %c0_i32_0 : i32, i32
  }
  func.func @transform_6(%arg0: i32) -> (i32, i32) {
    %c0_i32 = arith.constant 0 : i32
    %c0_i32_0 = arith.constant 0 : i32
    %c0_i32_1 = arith.constant 0 : i32
    return %c0_i32, %c0_i32_0 : i32, i32
  }
  func.func @transform_7(%arg0: i32) -> (i32, i32) {
    %c0_i32 = arith.constant 0 : i32
    %c0_i32_0 = arith.constant 0 : i32
    return %c0_i32, %arg0 : i32, i32
  }
}

</mosaic_0001>

<bundles_post_ra>
// kernel: tpu_custom_call.1
= control target key start
LH: loop header
LB: loop body
LE: loop exit
PB: predicated region body
PF: predicated region fallthrough
CT: control target
= control target key end

     0   :  { %12 = vsyncpa [#allocation3], 0  ;;  %s1414_s0 = inlined_call_operand.vmem [shape: f32[256,2], index: 0, kind: input, shape index: {}]   ;;  %s1415_s1 = inlined_call_operand.vmem [shape: f32[2,128], index: 1, kind: input, shape index: {}]   ;;  %s1416_s2 = inlined_call_operand.vmem [shape: f32[1,128], index: 2, kind: input, shape index: {}]   ;;  %s1417_s3 = inlined_call_operand.vmem [shape: bf16[128,128], index: 3, kind: input, shape index: {}]   ;;  %s1418_s4 = inlined_call_operand.vmem [shape: f32[1,128], index: 4, kind: input, shape index: {}]   ;;  %s1419_s5 = inlined_call_operand.vmem [shape: bf16[128,128], index: 5, kind: input, shape index: {}]   ;;  %s1420_s6 = inlined_call_operand.vmem [shape: f32[1,128], index: 6, kind: input, shape index: {}]   ;;  %s1421_s7 = inlined_call_operand.hbm [shape: f32[8,256], index: 7, kind: output, shape index: {}]  }
   0x1   :  { %14 = vsyncpa [#allocation3 + $0x1], 0  ;;  %s1180_s24 = smov 0   ;;  %s1182_s25 = smov 0  }
   0x2   :  { %s1184_s26 = smov 0   ;;  %s1186_s27 = smov 0  }
   0x3 LB: > { %s1201_s28 = sadd.s32 4294967295, %s1136_s27   ;;  %s901_s29 = sadd.s32 4294967294, %s1136_s27   ;;  %s1136_s27 = sphi %s1186_s27, %s1427_s27   ;;  %s1132_s26 = sphi %s1184_s26, %s1426_s26   ;;  %s1128_s25 = sphi %s1182_s25, %s1425_s25   ;;  %s1124_s24 = sphi %s1180_s24, %s1424_s24  }
   0x4   : > { %s1205_s30 = sadd.s32 1, %s1136_s27   ;;  %s179_s8 = sadd.s32 1, %s1132_s26 }
   0x5   : > { %s176_s9 = ssub.s32 %s1136_s27, %s1205_s30  ;;  %p189_p0 = scmp.ne.s32.totalorder %s1132_s26, %s1128_s25 }
   0x6   : > { %p177_p1 = scmp.eq.s32.totalorder %s176_s9, 0  ;;  %p190_p2 = scmp.eq.s32.totalorder %s1201_s28, 1 }
   0x7   : > { %p195_p3 = scmp.ne.s32.totalorder %s1128_s25, %s1124_s24  ;;  %p196_p4 = scmp.eq.s32.totalorder %s901_s29, 1 }
   0x8   : > { %s1216_s10 = scalar_select %p177_p1, %s1132_s26, %s179_s8  }
   0x9   : > { %p1218_p5 = por %p190_p2, %p189_p0  ;;  %p1222_p6 = por %p196_p4, %p195_p3 }
   0xa   : > { %p904_p7 = scmp.ge.s32.totalorder %s1136_s27, 1  ;;  %p241_p8 = scmp.lt.s32.totalorder %s1136_s27, 3 }
   0xc   : > { %p242_p9 = pnand %p904_p7, %p241_p8 }
   0xd   : > { %s906_s13 = sshll.u32 (!%p242_p9), %s1201_s28, 4  ;;  %s270_s16 = sand.u32 (!%p242_p9), 1, %s1128_s25  }
   0xe   : > { %245 = sbr.rel (%p242_p9) target bundleno = 645 (0x285), region = 48  ;;  %p274_p10 = scmp.lt.s32.totalorder (!%p242_p9), %s906_s13, 31 }
   0xf   : > { %s905_s18 = sshll.u32 (!%p242_p9), %s270_s16, 3  ;;  %s827_s8 = scalar_lea.sflag (!%p242_p9), [#allocation3], %s270_s16 }
  0x10   : > { %s272_s22 = scalar_lea.vmem (!%p242_p9), [#allocation2], %s905_s18  ;;  %s1094_s15 = scalar_lea.hbm (!%p242_p9), %s1421_s7, 16 }
  0x11   : > { %s839_s23 = sshll.u32 (!%p242_p9), %s272_s22, 4  ;;  %s840_s23 = int_to_ptr.vmem [resolvable:$true] %s839_s23 }
  0x13   : > { %v1138_v0 = vmov 1   ;;  %v1139_v1 = vmov 0   ;;  %s1429_s13 = smov (!%p274_p10, %s906_s13), 31  ;;  %v983_v17 = vld [vmem:[%s1417_s3 + $0x38] sm:$0xff]  ;;  %v982_v18 = vld [vmem:[%s1417_s3 + $0x30] sm:$0xff]  ;;  %v981_v19 = vld [vmem:[%s1417_s3 + $0x28] sm:$0xff] }
  0x14   : > { %1050 = vset.pattern.permute.xlu1 %v1138_v0  ;;  %1051 = vset.pattern.permute.xlu2 %v1139_v1  ;;  %s907_s14 = sshll.u32 %s1429_s13, 3  ;;  %v980_v20 = vld [vmem:[%s1417_s3 + $0x20] sm:$0xff]  ;;  %v979_v21 = vld [vmem:[%s1417_s3 + $0x18] sm:$0xff]  ;;  %v978_v23 = vld [vmem:[%s1417_s3 + $0x10] sm:$0xff] }
  0x15   : > { %1049 = vset.pattern.permute.xlu0 %v1139_v1  ;;  %s1235_s17 = scalar_lea.vmem %s1414_s0, %s907_s14  ;;  %602 = vmatpush.bf16.msra.mxu0 %v983_v17  ;;  %v977_v24 = vld [vmem:[%s1417_s3 + $0x8] sm:$0xff]  ;;  %v976_v26 = vld [vmem:[%s1417_s3] sm:$0xff] }
  0x16   : > { %v287_v2 = vld [vmem:[%s1235_s17 + $0x40] sm:$0xff]  ;;  %v288_v4 = vld [vmem:[%s1235_s17 + $0x48] sm:$0xff]  ;;  %v281_v6 = vld [vmem:[%s1235_s17 + $0x10] sm:$0xff]  ;;  %992 = vmatpush.bf16.msra.mxu2 %v983_v17 }
  0x17   : > { %v279_v3 = vld [vmem:[%s1235_s17] sm:$0xff]  ;;  %338 = vperm.xlu2 %1051, %v287_v2   ;;  %v280_v5 = vld [vmem:[%s1235_s17 + $0x8] sm:$0xff]  ;;  %v282_v7 = vld [vmem:[%s1235_s17 + $0x18] sm:$0xff] }
  0x18   : > { %394 = vperm.xlu1 %1050, %v279_v3   ;;  %298 = vperm.xlu0 %1049, %v279_v3   ;;  %v289_v8 = vld [vmem:[%s1235_s17 + $0x50] sm:$0xff]  ;;  %v290_v9 = vld [vmem:[%s1235_s17 + $0x58] sm:$0xff]  ;;  %v284_v10 = vld [vmem:[%s1235_s17 + $0x28] sm:$0xff] }
  0x19   : > { %v283_v11 = vld [vmem:[%s1235_s17 + $0x20] sm:$0xff]  ;;  %v286_v13 = vld [vmem:[%s1235_s17 + $0x38] sm:$0xff]  ;;  %v292_v14 = vld [vmem:[%s1235_s17 + $0x68] sm:$0xff]  ;;  %603 = vmatpush.bf16.msra.mxu0 %v982_v18 }
  0x1a   : > { %v291_v12 = vld [vmem:[%s1235_s17 + $0x60] sm:$0xff]  ;;  %v293_v15 = vld [vmem:[%s1235_s17 + $0x70] sm:$0xff]  ;;  %993 = vmatpush.bf16.msra.mxu2 %v982_v18  ;;  %v294_v22 = vld [vmem:[%s1235_s17 + $0x78] sm:$0xff] }
  0x1b   : > { %v285_v16 = vld [vmem:[%s1235_s17 + $0x30] sm:$0xff]  ;;  %v295_v28 = vld [vmem:[%s1415_s1] sm:$0x3]  ;;  %s973_s17 = sshll.u32 %s1201_s28, 3 }
  0x1c   : > { %v1295_v29 = vperm.slane %v295_v28, 0  ;;  %v1297_v30 = vperm.slane %v295_v28, 1  ;;  %v1304_v38 = vld [vmem:[%s1416_s2] ss:$0 sm:$0xff]  ;;  %s837_s21 = scalar_lea.hbm %s1421_s7, %s973_s17 }
  0x1d   : > { %604 = vmatpush.bf16.msra.mxu0 %v981_v19  ;;  %s841_s29 = sshll.u32 %s837_s21, 4  ;;  %s842_s29 = int_to_ptr.hbm [resolvable:$true] %s841_s29 }
  0x1e   : > { %994 = vmatpush.bf16.msra.mxu2 %v981_v19  ;;  %s1088_s9 = sshra.s32 %s842_s29, 4  ;;  %s1089_s9 = int_to_ptr.hbm [resolvable:$true] %s1088_s9 }
  0x1f   : > { %343 = vperm.xlu2 %1051, %v288_v4   ;;  %s1090_s13 = scalar_lea.hbm %s1089_s9, 8  ;;  %p1095_p0 = scmp.lt.s32.totalorder %s1089_s9, %s1421_s7 }
  0x20   : > { %398 = vperm.xlu1 %1050, %v280_v5   ;;  %303 = vperm.xlu0 %1049, %v280_v5   ;;  %p1091_p11 = scmp.ne.s32.totalorder %s1089_s9, %s1090_s13  ;;  %p1096_p1 = scmp.lt.s32.totalorder %s1094_s15, %s1090_s13 }
  0x21   : > { %605 = vmatpush.bf16.msra.mxu0 %v980_v20 }
  0x22   : > { %995 = vmatpush.bf16.msra.mxu2 %v980_v20  ;;  %p1092_p12 = pnand %p1091_p11, %p1218_p5  ;;  %p1097_p2 = por %p1096_p1, %p1095_p0 }
  0x24   : > { %p1093_p13 = pneg %p1092_p12 }
  0x25   : > { %606 = vmatpush.bf16.msra.mxu0 %v979_v21 }
  0x26   : > { %996 = vmatpush.bf16.msra.mxu2 %v979_v21  ;;  %p1098_p3 = pnand %p1097_p2, %p1093_p13 }
  0x27   : > { %308 = vperm.xlu2 %1051, %v281_v6  }
  0x28   : > { %430 = vperm.xlu1 %1050, %v288_v4   ;;  %1052 = vset.pattern.permute.xlu0 %v1138_v0 }
  0x29   : > { %426 = vperm.xlu0 %1052, %v287_v2   ;;  %607 = vmatpush.bf16.msra.mxu0 %v978_v23 }
  0x2a   : > { %997 = vmatpush.bf16.msra.mxu2 %v978_v23 }
  0x2d   : > { %608 = vmatpush.bf16.msra.mxu0 %v977_v24 }
  0x2e   : > { %998 = vmatpush.bf16.msra.mxu2 %v977_v24 }
  0x2f   : > { %1054 = vset.pattern.permute.xlu2 %v1138_v0 }
  0x30   : > { %1053 = vset.pattern.permute.xlu1 %v1139_v1  ;;  %402 = vperm.xlu2 %1054, %v281_v6  }
  0x31   : > { %313 = vperm.xlu1 %1053, %v282_v7   ;;  %406 = vperm.xlu0 %1052, %v282_v7  }
  0x32   : > { %609 = vmatpush.bf16.msra.mxu0 %v976_v26  ;;  %999 = vmatpush.bf16.msra.mxu2 %v976_v26 }
  0x38   : > { %1055 = vset.pattern.permute.xlu2 %v1139_v1 }
  0x39   : > { %348 = vperm.xlu1 %1053, %v289_v8   ;;  %434 = vperm.xlu0 %1052, %v289_v8  }
  0x3a   : > { %353 = vperm.xlu2 %1055, %v290_v9  }
  0x41   : > { %1056 = vset.pattern.permute.xlu1 %v1138_v0  ;;  %1057 = vset.pattern.permute.xlu0 %v1139_v1 }
  0x42   : > { %438 = vperm.xlu1 %1056, %v290_v9   ;;  %323 = vperm.xlu0 %1057, %v284_v10  }
  0x43   : > { %318 = vperm.xlu2 %1055, %v283_v11  }
  0x4a   : > { %410 = vperm.xlu1 %1056, %v283_v11   ;;  %1061 = vset.pattern.permute.xlu0 %v1138_v0 }
  0x4b   : > { %1058 = vset.pattern.permute.xlu2 %v1138_v0  ;;  %442 = vperm.xlu0 %1061, %v291_v12  }
  0x4c   : > { %414 = vperm.xlu2 %1058, %v284_v10  }
  0x52   : > { %1059 = vset.pattern.permute.xlu1 %v1139_v1 }
  0x53   : > { %358 = vperm.xlu1 %1059, %v291_v12   ;;  %422 = vperm.xlu0 %1061, %v286_v13  }
  0x54   : > { %1060 = vset.pattern.permute.xlu2 %v1139_v1 }
  0x55   : > { %363 = vperm.xlu2 %1060, %v292_v14  }
  0x5b   : > { %1062 = vset.pattern.permute.xlu1 %v1138_v0  ;;  %450 = vperm.xlu0 %1061, %v293_v15  }
  0x5c   : > { %446 = vperm.xlu1 %1062, %v292_v14  }
  0x5d   : > { %328 = vperm.xlu2 %1060, %v285_v16  }
  0x64   : > { %1063 = vset.pattern.permute.xlu1 %v1139_v1 }
  0x65   : > { %333 = vperm.xlu1 %1063, %v286_v13   ;;  %1064 = vset.pattern.permute.xlu2 %v1138_v0 }
  0x66   : > { %418 = vperm.xlu2 %1064, %v285_v16  }
  0x6d   : > { %368 = vperm.xlu1 %1063, %v293_v15  }
  0x6e   : > { %1065 = vset.pattern.permute.xlu2 %v1139_v1 }
  0x6f   : > { %373 = vperm.xlu2 %1065, %v294_v22  }
  0x71   : > { %v339_v25 = vpop.permute.xlu2 %338 }
  0x72   : > { %v385_v53 = vmul.f32 %v1295_v29, %v339_v25 }
  0x75   : > { %1066 = vset.pattern.permute.xlu1 %v1138_v0 }
  0x76   : > { %454 = vperm.xlu1 %1066, %v294_v22  }
  0x79   : > { %v344_v27 = vpop.permute.xlu2 %343 }
  0x7a   : > { %v386_v49 = vmul.f32 %v1295_v29, %v344_v27 }
  0x81   : > { %v309_v32 = vpop.permute.xlu2 %308 }
  0x82   : > { %v379_v57 = vmul.f32 %v1295_v29, %v309_v32 }
  0x8a   : > { %v395_v31 = vpop.permute.xlu1 %394  ;;  %v299_v33 = vpop.permute.xlu0 %298 }
  0x8b   : > { %v458_v34 = vmul.f32 %v1297_v30, %v395_v31  ;;  %v377_v35 = vmul.f32 %v1295_v29, %v299_v33  ;;  %v403_v42 = vpop.permute.xlu2 %402 }
  0x8c   : > { %v460_v58 = vmul.f32 %v1297_v30, %v403_v42 }
  0x8d   : > { %v474_v36 = vadd.f32 %v458_v34, %v377_v35 }
  0x8e   : > { %v476_v63 = vadd.f32 %v460_v58, %v379_v57 }
  0x8f   : > { %v494_v44 = vadd.f32 %v1304_v38, %v474_v36 }
  0x90   : > { %v496_v8 = vadd.f32 %v1304_v38, %v476_v63  ;;  %v990_v63 = vld [vmem:[%s1419_s5 + $0x30] sm:$0xff] }
  0x91   : > { %v510_v47 = vmax.f32 %v494_v44, 0.0 }
  0x92   : > { %v399_v37 = vpop.permute.xlu1 %398  ;;  %v304_v40 = vpop.permute.xlu0 %303  ;;  %v512_v11 = vmax.f32 %v496_v8, 0.0 }
  0x93   : > { %v459_v39 = vmul.f32 %v1297_v30, %v399_v37  ;;  %v378_v41 = vmul.f32 %v1295_v29, %v304_v40 }
  0x94   : > { %v354_v56 = vpop.permute.xlu2 %353 }
  0x95   : > { %v475_v43 = vadd.f32 %v459_v39, %v378_v41  ;;  %v388_v20 = vmul.f32 %v1295_v29, %v354_v56 }
  0x97   : > { %v495_v45 = vadd.f32 %v1304_v38, %v475_v43 }
  0x99   : > { %v511_v48 = vmax.f32 %v495_v45, 0.0 }
  0x9a   : > { %v431_v46 = vpop.permute.xlu1 %430 }
  0x9b   : > { %v467_v50 = vmul.f32 %v1297_v30, %v431_v46  ;;  %v427_v51 = vpop.permute.xlu0 %426  ;;  %v542_v52 = vpack.c.bf16 %v511_v48, %v510_v47 }
  0x9c   : > { %v466_v55 = vmul.f32 %v1297_v30, %v427_v51 }
  0x9d   : > { %v483_v54 = vadd.f32 %v467_v50, %v386_v49  ;;  %610 = vmatmul.bf16.vlgmr.msra.gmra.mxu0 %v542_v52  ;;  %v319_v7 = vpop.permute.xlu2 %318 }
  0x9e   : > { %v482_v59 = vadd.f32 %v466_v55, %v385_v53  ;;  %v381_v35 = vmul.f32 %v1295_v29, %v319_v7 }
  0x9f   : > { %v503_v60 = vadd.f32 %v1304_v38, %v483_v54 }
  0xa0   : > { %v502_v61 = vadd.f32 %v1304_v38, %v482_v59 }
  0xa1   : > { %v519_v62 = vmax.f32 %v503_v60, 0.0  ;;  %v991_v60 = vld [vmem:[%s1419_s5 + $0x38] sm:$0xff] }
  0xa2   : > { %v518_v1 = vmax.f32 %v502_v61, 0.0  ;;  %727 = vmatpush.bf16.msra.mxu1 %v991_v60  ;;  %1000 = vmatpush.bf16.msra.mxu3 %v991_v60 }
  0xa3   : > { %v314_v0 = vpop.permute.xlu1 %313  ;;  %v407_v3 = vpop.permute.xlu0 %406 }
  0xa4   : > { %v380_v2 = vmul.f32 %v1295_v29, %v314_v0  ;;  %v461_v4 = vmul.f32 %v1297_v30, %v407_v3  ;;  %v546_v5 = vpack.c.bf16 %v519_v62, %v518_v1 }
  0xa6   : > { %v477_v6 = vadd.f32 %v461_v4, %v380_v2  ;;  %630 = vmatmul.bf16.vlgmr.msra.gmra.mxu2 %v546_v5  ;;  %v415_v17 = vpop.permute.xlu2 %414  ;;  %728 = vmatpush.bf16.msra.mxu1 %v990_v63 }
  0xa7   : > { %v463_v21 = vmul.f32 %v1297_v30, %v415_v17  ;;  %1001 = vmatpush.bf16.msra.mxu3 %v990_v63 }
  0xa8   : > { %v497_v9 = vadd.f32 %v1304_v38, %v477_v6  ;;  %v989_v6 = vld [vmem:[%s1419_s5 + $0x28] sm:$0xff] }
  0xaa   : > { %v513_v12 = vmax.f32 %v497_v9, 0.0  ;;  %729 = vmatpush.bf16.msra.mxu1 %v989_v6 }
  0xab   : > { %v349_v10 = vpop.permute.xlu1 %348  ;;  %v435_v13 = vpop.permute.xlu0 %434  ;;  %1002 = vmatpush.bf16.msra.mxu3 %v989_v6 }
  0xac   : > { %v543_v14 = vpack.c.bf16 %v513_v12, %v512_v11  ;;  %v387_v15 = vmul.f32 %v1295_v29, %v349_v10  ;;  %v468_v16 = vmul.f32 %v1297_v30, %v435_v13  ;;  %v988_v10 = vld [vmem:[%s1419_s5 + $0x20] sm:$0xff] }
  0xae   : > { %615 = vmatmul.bf16.gmra.mxu0 %v543_v14  ;;  %v484_v18 = vadd.f32 %v468_v16, %v387_v15  ;;  %730 = vmatpush.bf16.msra.mxu1 %v988_v10  ;;  %v987_v15 = vld [vmem:[%s1419_s5 + $0x18] sm:$0xff] }
  0xaf   : > { %v364_v31 = vpop.permute.xlu2 %363  ;;  %1003 = vmatpush.bf16.msra.mxu3 %v988_v10  ;;  %v1069_v10 = vld [vmem:[%s1420_s6] ss:$0 sm:$0xff] }
  0xb0   : > { %v504_v26 = vadd.f32 %v1304_v38, %v484_v18  ;;  %v390_v52 = vmul.f32 %v1295_v29, %v364_v31 }
  0xb2   : > { %v520_v32 = vmax.f32 %v504_v26, 0.0  ;;  %731 = vmatpush.bf16.msra.mxu1 %v987_v15 }
  0xb3   : > { %1004 = vmatpush.bf16.msra.mxu3 %v987_v15 }
  0xb4   : > { %v439_v19 = vpop.permute.xlu1 %438  ;;  %v324_v23 = vpop.permute.xlu0 %323 }
  0xb5   : > { %v469_v22 = vmul.f32 %v1297_v30, %v439_v19  ;;  %v382_v24 = vmul.f32 %v1295_v29, %v324_v23 }
  0xb7   : > { %v485_v25 = vadd.f32 %v469_v22, %v388_v20  ;;  %v479_v27 = vadd.f32 %v463_v21, %v382_v24  ;;  %v329_v44 = vpop.permute.xlu2 %328 }
  0xb8   : > { %v383_v57 = vmul.f32 %v1295_v29, %v329_v44 }
  0xb9   : > { %v505_v28 = vadd.f32 %v1304_v38, %v485_v25  ;;  %v499_v39 = vadd.f32 %v1304_v38, %v479_v27 }
  0xbb   : > { %v521_v33 = vmax.f32 %v505_v28, 0.0  ;;  %v515_v42 = vmax.f32 %v499_v39, 0.0 }
  0xbc   : > { %v411_v34 = vpop.permute.xlu1 %410 }
  0xbd   : > { %v462_v36 = vmul.f32 %v1297_v30, %v411_v34  ;;  %v547_v37 = vpack.c.bf16 %v521_v33, %v520_v32  ;;  %v443_v47 = vpop.permute.xlu0 %442  ;;  %v986_v32 = vld [vmem:[%s1419_s5 + $0x10] sm:$0xff]  ;;  %v1068_v33 = vld [vmem:[%s1418_s4] ss:$0 sm:$0xff] }
  0xbe   : > { %v470_v48 = vmul.f32 %v1297_v30, %v443_v47  ;;  %732 = vmatpush.bf16.msra.mxu1 %v986_v32  ;;  %1005 = vmatpush.bf16.msra.mxu3 %v986_v32 }
  0xbf   : > { %v478_v40 = vadd.f32 %v462_v36, %v381_v35  ;;  %635 = vmatmul.bf16.gmra.mxu2 %v547_v37 }
  0xc0   : > { %v419_v53 = vpop.permute.xlu2 %418 }
  0xc1   : > { %v498_v41 = vadd.f32 %v1304_v38, %v478_v40  ;;  %v464_v58 = vmul.f32 %v1297_v30, %v419_v53 }
  0xc3   : > { %v514_v43 = vmax.f32 %v498_v41, 0.0  ;;  %v480_v0 = vadd.f32 %v464_v58, %v383_v57 }
  0xc5   : > { %v359_v45 = vpop.permute.xlu1 %358  ;;  %v544_v46 = vpack.c.bf16 %v515_v42, %v514_v43  ;;  %v423_v1 = vpop.permute.xlu0 %422  ;;  %v500_v8 = vadd.f32 %v1304_v38, %v480_v0 }
  0xc6   : > { %v389_v49 = vmul.f32 %v1295_v29, %v359_v45  ;;  %v465_v4 = vmul.f32 %v1297_v30, %v423_v1 }
  0xc7   : > { %620 = vmatmul.bf16.gmra.mxu0 %v544_v46  ;;  %v516_v11 = vmax.f32 %v500_v8, 0.0 }
  0xc8   : > { %v486_v50 = vadd.f32 %v470_v48, %v389_v49 }
  0xc9   : > { %v374_v18 = vpop.permute.xlu2 %373 }
  0xca   : > { %v506_v56 = vadd.f32 %v1304_v38, %v486_v50  ;;  %v392_v21 = vmul.f32 %v1295_v29, %v374_v18 }
  0xcc   : > { %v522_v61 = vmax.f32 %v506_v56, 0.0 }
  0xcd   : > { %v451_v16 = vpop.permute.xlu0 %450 }
  0xce   : > { %v447_v51 = vpop.permute.xlu1 %446  ;;  %v472_v19 = vmul.f32 %v1297_v30, %v451_v16 }
  0xcf   : > { %v471_v54 = vmul.f32 %v1297_v30, %v447_v51 }
  0xd1   : > { %v487_v55 = vadd.f32 %v471_v54, %v390_v52 }
  0xd3   : > { %v507_v59 = vadd.f32 %v1304_v38, %v487_v55 }
  0xd5   : > { %v523_v62 = vmax.f32 %v507_v59, 0.0 }
  0xd7   : > { %v334_v2 = vpop.permute.xlu1 %333  ;;  %v548_v3 = vpack.c.bf16 %v523_v62, %v522_v61 }
  0xd8   : > { %v384_v5 = vmul.f32 %v1295_v29, %v334_v2 }
  0xd9   : > { %640 = vmatmul.bf16.gmra.mxu2 %v548_v3 }
  0xda   : > { %v481_v7 = vadd.f32 %v465_v4, %v384_v5 }
  0xdc   : > { %v501_v9 = vadd.f32 %v1304_v38, %v481_v7 }
  0xde   : > { %v517_v12 = vmax.f32 %v501_v9, 0.0 }
  0xdf   : > { %v369_v13 = vpop.permute.xlu1 %368 }
  0xe0   : > { %v545_v14 = vpack.c.bf16 %v517_v12, %v516_v11  ;;  %v391_v17 = vmul.f32 %v1295_v29, %v369_v13  ;;  %v985_v29 = vld [vmem:[%s1419_s5 + $0x8] sm:$0xff] }
  0xe1   : > { %733 = vmatpush.bf16.msra.mxu1 %v985_v29  ;;  %1006 = vmatpush.bf16.msra.mxu3 %v985_v29 }
  0xe2   : > { %625 = vmatmul.bf16.gmra.mxu0 %v545_v14  ;;  %v488_v20 = vadd.f32 %v472_v19, %v391_v17 }
  0xe4   : > { %v508_v25 = vadd.f32 %v1304_v38, %v488_v20 }
  0xe6   : > { %v524_v27 = vmax.f32 %v508_v25, 0.0 }
  0xe8   : > { %v455_v22 = vpop.permute.xlu1 %454 }
  0xe9   : > { %v473_v23 = vmul.f32 %v1297_v30, %v455_v22  ;;  %v984_v30 = vld [vmem:[%s1419_s5] sm:$0xff] }
  0xea   : > { %734 = vmatpush.bf16.msra.mxu1 %v984_v30  ;;  %1007 = vmatpush.bf16.msra.mxu3 %v984_v30 }
  0xeb   : > { %v489_v24 = vadd.f32 %v473_v23, %v392_v21 }
  0xed   : > { %v509_v26 = vadd.f32 %v1304_v38, %v489_v24 }
  0xef   : > { %v525_v28 = vmax.f32 %v509_v26, 0.0 }
  0xf1   : > { %v549_v31 = vpack.c.bf16 %v525_v28, %v524_v27 }
  0xf3   : > { %645 = vmatmul.bf16.gmra.mxu2 %v549_v31 }
 0x11a   : > { %v611_v38 = vpop.f32.mrf.mxu0 }
 0x11b   : > { %v612_v35 = vadd.f32 %v1068_v33, %v611_v38 }
 0x122   : > { %v613_v34 = vpop.f32.mrf.mxu0 }
 0x123   : > { %v614_v36 = vadd.f32 %v1068_v33, %v613_v34 }
 0x125   : > { %v667_v37 = vpack.c.bf16 %v614_v36, %v612_v35 }
 0x127   : > { %735 = vmatmul.bf16.vlgmr.msra.gmra.mxu1 %v667_v37 }
 0x129   : > { %v631_v39 = vpop.f32.mrf.mxu2 }
 0x12a   : > { %v632_v42 = vadd.f32 %v1068_v33, %v631_v39 }
 0x12b   : > { %v616_v40 = vpop.f32.mrf.mxu0 }
 0x12c   : > { %v617_v45 = vadd.f32 %v1068_v33, %v616_v40 }
 0x131   : > { %v633_v41 = vpop.f32.mrf.mxu2 }
 0x132   : > { %v634_v43 = vadd.f32 %v1068_v33, %v633_v41 }
 0x133   : > { %v618_v44 = vpop.f32.mrf.mxu0 }
 0x134   : > { %v619_v46 = vadd.f32 %v1068_v33, %v618_v44  ;;  %v671_v47 = vpack.c.bf16 %v634_v43, %v632_v42 }
 0x136   : > { %755 = vmatmul.bf16.vlgmr.msra.gmra.mxu3 %v671_v47  ;;  %v668_v48 = vpack.c.bf16 %v619_v46, %v617_v45 }
 0x138   : > { %740 = vmatmul.bf16.gmra.mxu1 %v668_v48 }
 0x142   : > { %v636_v49 = vpop.f32.mrf.mxu2 }
 0x143   : > { %v637_v52 = vadd.f32 %v1068_v33, %v636_v49 }
 0x144   : > { %v621_v50 = vpop.f32.mrf.mxu0 }
 0x145   : > { %v622_v55 = vadd.f32 %v1068_v33, %v621_v50 }
 0x14a   : > { %v638_v51 = vpop.f32.mrf.mxu2 }
 0x14b   : > { %v639_v53 = vadd.f32 %v1068_v33, %v638_v51 }
 0x14c   : > { %v623_v54 = vpop.f32.mrf.mxu0 }
 0x14d   : > { %v624_v56 = vadd.f32 %v1068_v33, %v623_v54  ;;  %v672_v57 = vpack.c.bf16 %v639_v53, %v637_v52 }
 0x14f   : > { %760 = vmatmul.bf16.gmra.mxu3 %v672_v57  ;;  %v669_v58 = vpack.c.bf16 %v624_v56, %v622_v55 }
 0x151   : > { %745 = vmatmul.bf16.gmra.mxu1 %v669_v58 }
 0x15c   : > { %v641_v59 = vpop.f32.mrf.mxu2 }
 0x15d   : > { %v642_v62 = vadd.f32 %v1068_v33, %v641_v59 }
 0x15f   : > { %v626_v60 = vpop.f32.mrf.mxu0 }
 0x160   : > { %v627_v2 = vadd.f32 %v1068_v33, %v626_v60 }
 0x164   : > { %v643_v61 = vpop.f32.mrf.mxu2 }
 0x165   : > { %v644_v63 = vadd.f32 %v1068_v33, %v643_v61 }
 0x167   : > { %v628_v0 = vpop.f32.mrf.mxu0  ;;  %v673_v1 = vpack.c.bf16 %v644_v63, %v642_v62 }
 0x168   : > { %v629_v3 = vadd.f32 %v1068_v33, %v628_v0 }
 0x169   : > { %765 = vmatmul.bf16.gmra.mxu3 %v673_v1 }
 0x16a   : > { %v670_v4 = vpack.c.bf16 %v629_v3, %v627_v2 }
 0x16c   : > { %750 = vmatmul.bf16.gmra.mxu1 %v670_v4 }
 0x176   : > { %v646_v5 = vpop.f32.mrf.mxu2 }
 0x177   : > { %v647_v7 = vadd.f32 %v1068_v33, %v646_v5 }
 0x17e   : > { %v648_v6 = vpop.f32.mrf.mxu2 }
 0x17f   : > { %v649_v8 = vadd.f32 %v1068_v33, %v648_v6 }
 0x181   : > { %v674_v9 = vpack.c.bf16 %v649_v8, %v647_v7 }
 0x183   : > { %770 = vmatmul.bf16.gmra.mxu3 %v674_v9 }
 0x1a4   : > { %v736_v11 = vpop.f32.mrf.mxu1 }
 0x1a5   : > { %v737_v12 = vadd.f32 %v1069_v10, %v736_v11 }
 0x1a7   : > { %776 = vxpose.xlu2.b32.start [1/16] (narrow) %v737_v12, 8 }
 0x1ac   : > { %v738_v13 = vpop.f32.mrf.mxu1 }
 0x1ad   : > { %v739_v14 = vadd.f32 %v1069_v10, %v738_v13 }
 0x1af   : > { %777 = vxpose.xlu2.b32.cont [2/16] (narrow) %v739_v14, 8 }
 0x1b5   : > { %v741_v15 = vpop.f32.mrf.mxu1 }
 0x1b6   : > { %v742_v16 = vadd.f32 %v1069_v10, %v741_v15 }
 0x1b8   : > { %778 = vxpose.xlu2.b32.cont [3/16] (narrow) %v742_v16, 8 }
 0x1b9   : > { %v756_v25 = vpop.f32.mrf.mxu3 }
 0x1ba   : > { %v757_v31 = vadd.f32 %v1069_v10, %v756_v25 }
 0x1bd   : > { %v743_v17 = vpop.f32.mrf.mxu1 }
 0x1be   : > { %v744_v18 = vadd.f32 %v1069_v10, %v743_v17 }
 0x1c0   : > { %779 = vxpose.xlu2.b32.cont [4/16] (narrow) %v744_v18, 8 }
 0x1c1   : > { %v758_v28 = vpop.f32.mrf.mxu3 }
 0x1c2   : > { %v759_v29 = vadd.f32 %v1069_v10, %v758_v28 }
 0x1ce   : > { %v746_v19 = vpop.f32.mrf.mxu1 }
 0x1cf   : > { %v747_v20 = vadd.f32 %v1069_v10, %v746_v19 }
 0x1d1   : > { %780 = vxpose.xlu2.b32.cont [5/16] (narrow) %v747_v20, 8 }
 0x1d2   : > { %v761_v32 = vpop.f32.mrf.mxu3 }
 0x1d3   : > { %v762_v30 = vadd.f32 %v1069_v10, %v761_v32 }
 0x1d6   : > { %v748_v21 = vpop.f32.mrf.mxu1 }
 0x1d7   : > { %v749_v22 = vadd.f32 %v1069_v10, %v748_v21 }
 0x1d9   : > { %781 = vxpose.xlu2.b32.cont [6/16] (narrow) %v749_v22, 8 }
 0x1da   : > { %v763_v38 = vpop.f32.mrf.mxu3 }
 0x1db   : > { %v764_v33 = vadd.f32 %v1069_v10, %v763_v38 }
 0x1e9   : > { %v751_v23 = vpop.f32.mrf.mxu1 }
 0x1ea   : > { %v752_v24 = vadd.f32 %v1069_v10, %v751_v23 }
 0x1ec   : > { %782 = vxpose.xlu2.b32.cont [7/16] (narrow) %v752_v24, 8  ;;  %v766_v34 = vpop.f32.mrf.mxu3 }
 0x1ed   : > { %v767_v35 = vadd.f32 %v1069_v10, %v766_v34 }
 0x1f1   : > { %v753_v26 = vpop.f32.mrf.mxu1 }
 0x1f2   : > { %v754_v27 = vadd.f32 %v1069_v10, %v753_v26 }
 0x1f4   : > { %783 = vxpose.xlu2.b32.cont [8/16] (narrow) %v754_v27, 8  ;;  %v768_v36 = vpop.f32.mrf.mxu3 }
 0x1f5   : > { %v769_v37 = vadd.f32 %v1069_v10, %v768_v36 }
 0x1fc   : > { %784 = vxpose.xlu2.b32.cont [9/16] (narrow) %v757_v31, 8 }
 0x204   : > { %785 = vxpose.xlu2.b32.cont [10/16] (narrow) %v759_v29, 8 }
 0x206   : > { %v771_v39 = vpop.f32.mrf.mxu3 }
 0x207   : > { %v772_v40 = vadd.f32 %v1069_v10, %v771_v39 }
 0x20c   : > { %786 = vxpose.xlu2.b32.cont [11/16] (narrow) %v762_v30, 8 }
 0x20e   : > { %v773_v41 = vpop.f32.mrf.mxu3 }
 0x20f   : > { %v774_v42 = vadd.f32 %v1069_v10, %v773_v41 }
 0x214   : > { %787 = vxpose.xlu2.b32.cont [12/16] (narrow) %v764_v33, 8 }
 0x21c   : > { %788 = vxpose.xlu2.b32.cont [13/16] (narrow) %v767_v35, 8 }
 0x224   : > { %789 = vxpose.xlu2.b32.cont [14/16] (narrow) %v769_v37, 8 }
 0x22c   : > { %790 = vxpose.xlu2.b32.cont [15/16] (narrow) %v772_v40, 8 }
 0x234   : > { %791 = vxpose.xlu2.b32.end [16/16] (narrow) %v774_v42, 8 }
 0x255   : > { %v792_v43 = vpop.trf.xlu2 }
 0x256   : > { %v808_v44 = vrot.slane %v792_v43, 4 }
 0x258   : > { %v809_v45 = vmax.f32 %v792_v43, %v808_v44 }
 0x25a   : > { %v810_v46 = vrot.slane %v809_v45, 2 }
 0x25c   : > { %v811_v47 = vmax.f32 %v809_v45, %v810_v46 }
 0x25e   : > { %v812_v48 = vrot.slane %v811_v47, 1 }
 0x260   : > { %v813_v49 = vmax.f32 %v811_v47, %v812_v48 }
 0x262   : > { %v814_v50 = vsub.f32 %v792_v43, %v813_v49 }
 0x264   : > { %v815_v51 = vmul.f32 1.442695, %v814_v50 }
 0x266   : > { %1070 = vpow2.f32 %v815_v51 }
 0x26c   : > { %v1071_v52 = vpop.eup %1070 }
 0x26d   : > { %v817_v53 = vrot.slane %v1071_v52, 4 }
 0x26f   : > { %v818_v54 = vadd.f32 %v1071_v52, %v817_v53 }
 0x271   : > { %v819_v55 = vrot.slane %v818_v54, 2 }
 0x273   : > { %v820_v56 = vadd.f32 %v819_v55, %v818_v54 }
 0x275   : > { %v821_v57 = vrot.slane %v820_v56, 1 }
 0x277   : > { %v822_v58 = vadd.f32 %v821_v57, %v820_v56 }
 0x279   : > { %1072 = vrcp.f32 %v822_v58 }
 0x27f   : > { %v1073_v59 = vpop.eup %1072 }
 0x280   : > { %v824_v60 = vmul.f32 %v1073_v59, %v1071_v52 }
 0x282   : > { %825 = vst [vmem:[%s272_s22] sm:$0xff] %v824_v60 }
 0x283   : > { %1101 = shalt.err (!%p1098_p3)
}
 0x284   : > { %1008 = dma.vmem_to_hbm [thread:$0]  (%p1218_p5), %s840_s23, 128, %s842_s29, %s827_s8  }
 0x285 PF: > { %p1014_p4 = scmp.ge.s32.totalorder %s1136_s27, 2  ;;  %s853_s16 = sand.u32 1, %s1124_s24  }
 0x286   : > { %s854_s19 = scalar_lea.sflag [#allocation3], %s853_s16 }
 0x287   : > { %p1011_p7 = pnand %p1014_p4, %p1222_p6 }
 0x289   : > { %p1012_p8 = pneg %p1011_p7 }
 0x28b   : > { %1119 = dma.done.wait (%p1012_p8), %s854_s19, 128  }
 0x28c   : > { %1121 = vsyncadd (%p1012_p8), %s854_s19, 4294967168  ;;  %p17_p9 = scmp.ge.s32.totalorder %s1205_s30, 4   ;;  %s1424_s24 = smov %s1128_s25 }
 0x28d   : > { %s1425_s25 = smov %s1132_s26  ;;  %s1426_s26 = smov %s1216_s10 }
 0x28e   : > { %s1427_s27 = smov %s1205_s30  ;;  %19 = sbr.rel (!%p17_p9) target bundleno = 3 (0x3), region = 83 }
 0x293   :  { %860 = vsyncpa [#allocation3], 1 }
 0x294   :  { %862 = vsyncpa [#allocation3 + $0x1], 1 }

</bundles_post_ra>
